<compile_context>
chip_gen: v7x
topology: tpu7x:2x2x1
jax: 0.10.0
libtpu: 0.0.40
codegen_flags: <defaults>
</compile_context>

<pallas_src>
import functools

import jax
import jax.numpy as jnp
import numpy as np
from jax.experimental import pallas as pl
from jax.experimental.pallas import tpu as pltpu

EPS = 1e-5  # PyTorch InstanceNorm2d default eps


def cam_kernel(x_ref, win_ref, wout_ref, bias_ref, out_ref, *, cq, hw_true):
    # x_ref    : (Bblk, C_in, HW_pad)   batch block, channels-first, lane = HW
    # win_ref  : (3*Ch2, C_in)          fused "in" weights (zero cols for chunk 4)
    # wout_ref : (C_in, 3*Ch2)          fused "out" weights (gamma folded, base rows = sum)
    # bias_ref : (C_in, 1)              folded affine bias (base rows = sum of branches)
    # out_ref  : (Bblk, C_in, HW_pad)
    bblk, c_in, hw_pad = x_ref.shape

    win = win_ref[...]                              # io dtype (bf16 ok for MXU)
    wout = wout_ref[...]                            # f32
    bias = bias_ref[...]                            # f32
    inv_hw = jnp.float32(1.0 / hw_true)

    # rows >= 3*Cq are the "base" chunk -> add x4 there.
    row = jax.lax.broadcasted_iota(jnp.int32, (c_in, hw_pad), 0)
    base_mask = row >= 3 * cq

    for b in range(bblk):                           # static unroll over batch block
        x = x_ref[b]                                # (C_in, HW_pad)

        # fused 1x1 "in" convs over the FULL channel block (zero cols kill x4)
        y = jnp.dot(win, x, preferred_element_type=jnp.float32)   # (3*Ch2, HW_pad)

        # InstanceNorm2d stats per channel over HW (padded lanes are exact zeros,
        # divide by the true HW).  Single pass, f32, clamped variance.
        mean = jnp.sum(y, axis=-1, keepdims=True) * inv_hw          # (3*Ch2, 1)
        mean_sq = jnp.sum(y * y, axis=-1, keepdims=True) * inv_hw   # (3*Ch2, 1)
        var = jnp.maximum(mean_sq - mean * mean, 0.0)
        s = jax.lax.rsqrt(var + EPS)                                 # (3*Ch2, 1)
        shift = -mean * s                                            # (3*Ch2, 1)

        # Fold the per-image norm scale/shift into the second matmul:
        #   out = wout @ (y*s + shift) + bias = (wout * s^T) @ y + (bias + wout@shift)
        s_row = jnp.transpose(s)                                     # (1, 3*Ch2)
        shift_row = jnp.transpose(shift)                             # (1, 3*Ch2)
        wout_eff = wout * s_row                                      # (C_in, 3*Ch2), tiny
        bias_eff = bias + jnp.sum(wout * shift_row, axis=-1, keepdims=True)

        out = jnp.dot(wout_eff, y, preferred_element_type=jnp.float32) + bias_eff
        out = out + jnp.where(base_mask, x.astype(jnp.float32), 0.0)

        # single dense full-block store (unmasked: lane dim is a multiple of 128)
        out_ref[b] = out.astype(out_ref.dtype)


def cam_fold_params(w_in, w_out, gamma, beta):
    """Host-side (numpy) parameter folding -> fused block weights.

    w_in  : (3, Ch2, Cq)   Conv2d(Cq -> Ch2).weight[:, :, 0, 0] per branch
    w_out : (3, Cq, Ch2)   Conv2d(Ch2 -> Cq).weight[:, :, 0, 0] per branch
    gamma : (3, Ch2)       InstanceNorm2d affine weight per branch
    beta  : (3, Ch2)       InstanceNorm2d affine bias per branch
    Returns (win_big (3*Ch2, C_in), wout_big (C_in, 3*Ch2), bias_big (C_in, 1)), f32.
    """
    w_in = np.asarray(w_in, np.float32)
    w_out = np.asarray(w_out, np.float32)
    gamma = np.asarray(gamma, np.float32)
    beta = np.asarray(beta, np.float32)
    Ch2, Cq = w_in.shape[1], w_in.shape[2]
    C_in = 4 * Cq

    win_big = np.zeros((3 * Ch2, C_in), np.float32)
    wout_big = np.zeros((C_in, 3 * Ch2), np.float32)
    bias_big = np.zeros((C_in, 1), np.float32)
    for i in range(3):
        win_big[i * Ch2:(i + 1) * Ch2, i * Cq:(i + 1) * Cq] = w_in[i]
        wg = w_out[i] * gamma[i][None, :]                 # gamma folded into weights
        wout_big[i * Cq:(i + 1) * Cq, i * Ch2:(i + 1) * Ch2] = wg
        wout_big[3 * Cq:4 * Cq, i * Ch2:(i + 1) * Ch2] = wg        # base rows = sum
        b_i = w_out[i] @ beta[i]                          # beta folded into bias
        bias_big[i * Cq:(i + 1) * Cq, 0] = b_i
        bias_big[3 * Cq:4 * Cq, 0] += b_i
    return jnp.asarray(win_big), jnp.asarray(wout_big), jnp.asarray(bias_big)


@jax.jit
def cam_forward(x_nchw, win_big, wout_big, bias_big):
    """x_nchw: (N, C_in, H, W).  Returns (N, C_in, H, W) in x's dtype."""
    N, C_in, H, W = x_nchw.shape
    Cq = C_in // 4
    c3h = win_big.shape[0]                       # 3 * Ch2
    HW = H * W
    HW_pad = ((HW + 127) // 128) * 128           # lane-dense stores

    x = x_nchw.reshape(N, C_in, HW)              # plain reshape, no transpose
    if HW_pad != HW:
        x = jnp.pad(x, ((0, 0), (0, 0), (0, HW_pad - HW)))

    # --- batch blocking: amortize per-grid-step overhead -------------------
    itemsize = jnp.dtype(x_nchw.dtype).itemsize
    per_image = C_in * HW_pad * itemsize
    bblk = int(max(1, min((1 << 20) // per_image, 16)))   # ~<=1 MiB / block, cap unroll
    if N >= 2:
        bblk = min(bblk, max(1, N // 2))         # keep >= 2 grid steps (v7x megacore)
    bblk = max(1, min(bblk, N))
    n_pad = -(-N // bblk) * bblk
    if n_pad != N:
        x = jnp.pad(x, ((0, n_pad - N), (0, 0), (0, 0)))

    win = win_big.astype(x.dtype)                # first matmul in I/O dtype (bf16 ok)
    kernel = functools.partial(cam_kernel, cq=Cq, hw_true=HW)

    out = pl.pallas_call(
        kernel,
        out_shape=jax.ShapeDtypeStruct((n_pad, C_in, HW_pad), x.dtype),
        grid_spec=pltpu.PrefetchScalarGridSpec(
            num_scalar_prefetch=0,
            grid=(n_pad // bblk,),
            in_specs=[
                pl.BlockSpec((bblk, C_in, HW_pad), lambda b: (b, 0, 0)),
                pl.BlockSpec((c3h, C_in), lambda b: (0, 0)),
                pl.BlockSpec((C_in, c3h), lambda b: (0, 0)),
                pl.BlockSpec((C_in, 1), lambda b: (0, 0)),
            ],
            out_specs=pl.BlockSpec((bblk, C_in, HW_pad), lambda b: (b, 0, 0)),
        ),
        compiler_params=pltpu.CompilerParams(
            dimension_semantics=("parallel",)),
    )(x, win, wout_big, bias_big)

    return out[:N, :, :HW].reshape(N, C_in, H, W)


def cam_reference(x, w_in, w_out, gamma, beta):
    """Pure-JAX reference mirroring the PyTorch forward (NCHW, f32)."""
    N, C_in, H, W = x.shape
    Cq = C_in // 4
    chunks = [x[:, i * Cq:(i + 1) * Cq] for i in range(4)]
    outs = []
    for i in range(3):
        y = jnp.einsum('nchw,oc->nohw', chunks[i], w_in[i])
        mean = y.mean(axis=(2, 3), keepdims=True)
        var = ((y - mean) ** 2).mean(axis=(2, 3), keepdims=True)
        yn = (y - mean) / jnp.sqrt(var + EPS)
        yn = yn * gamma[i][None, :, None, None] + beta[i][None, :, None, None]
        outs.append(jnp.einsum('nchw,oc->nohw', yn, w_out[i]))
    base = outs[0] + outs[1] + outs[2] + chunks[3]
    return jnp.concatenate([outs[0], outs[1], outs[2], base], axis=1)


if __name__ == "__main__":
    # Small shapes consistent with the module: in_channels=16, channels=16.
    N, in_channels, H, W = 2, 16, 16, 16
    channels = 16
    Cq = in_channels // 4      # 4
    Ch2 = channels // 2        # 8

    key = jax.random.PRNGKey(0)
    k = jax.random.split(key, 5)
    x = jax.random.normal(k[0], (N, in_channels, H, W), jnp.float32)
    # Deterministic synthetic parameters (Conv2d weight layout (out, in)):
    w_in = jax.random.normal(k[1], (3, Ch2, Cq), jnp.float32) * 0.1
    w_out = jax.random.normal(k[2], (3, Cq, Ch2), jnp.float32) * 0.1
    gamma = 1.0 + 0.1 * jax.random.normal(k[3], (3, Ch2), jnp.float32)
    beta = 0.1 * jax.random.normal(k[4], (3, Ch2), jnp.float32)

    win_big, wout_big, bias_big = cam_fold_params(w_in, w_out, gamma, beta)

    # f32 path
    out = cam_forward(x, win_big, wout_big, bias_big)
    jax.block_until_ready(out)
    ref = cam_reference(x, w_in, w_out, gamma, beta)
    np.testing.assert_allclose(np.asarray(out), np.asarray(ref),
                               rtol=2e-4, atol=2e-4)

    # bf16 I/O path (memory-bound kernel: halves bytes moved on v6e/v7x)
    out_bf = cam_forward(x.astype(jnp.bfloat16), win_big, wout_big, bias_big)
    jax.block_until_ready(out_bf)
    np.testing.assert_allclose(np.asarray(out_bf.astype(jnp.float32)),
                               np.asarray(ref), rtol=1e-1, atol=1e-1)

    print("KERNEL_OK")
</pallas_src>

<mosaic_0001>
module attributes {stable_mosaic.version = 11 : i64} {
  func.func @cam_kernel(%arg0: i32, %arg1: memref<1x16x256xf32, #tpu.memory_space<vmem>>, %arg2: memref<24x16xf32, #tpu.memory_space<vmem>>, %arg3: memref<16x24xf32, #tpu.memory_space<vmem>>, %arg4: memref<16x1xf32, #tpu.memory_space<vmem>>, %arg5: memref<1x16x256xf32, #tpu.memory_space<vmem>>) attributes {dimension_semantics = [#tpu.dimension_semantics<parallel>], iteration_bounds = array<i64: 2>, scalar_prefetch = 0 : i64, scratch_operands = 0 : i64, tpu.core_type = #tpu.core_type<tc>, window_params = [{transform_indices = @transform_0, window_bounds = array<i64: 1, 16, 256>}, {pipeline_mode = #tpu.pipeline_mode<synchronous>, transform_indices = @transform_1, window_bounds = array<i64: 24, 16>}, {pipeline_mode = #tpu.pipeline_mode<synchronous>, transform_indices = @transform_2, window_bounds = array<i64: 16, 24>}, {pipeline_mode = #tpu.pipeline_mode<synchronous>, transform_indices = @transform_3, window_bounds = array<i64: 16, 1>}, {transform_indices = @transform_4, window_bounds = array<i64: 1, 16, 256>}]} {
    %c0 = arith.constant 0 : index
    %c0_0 = arith.constant 0 : index
    %0 = vector.load %arg2[%c0, %c0_0] : memref<24x16xf32, #tpu.memory_space<vmem>>, vector<24x16xf32>
    %c0_1 = arith.constant 0 : index
    %c0_2 = arith.constant 0 : index
    %1 = vector.load %arg3[%c0_1, %c0_2] : memref<16x24xf32, #tpu.memory_space<vmem>>, vector<16x24xf32>
    %c0_3 = arith.constant 0 : index
    %c0_4 = arith.constant 0 : index
    %2 = vector.load %arg4[%c0_3, %c0_4] : memref<16x1xf32, #tpu.memory_space<vmem>>, vector<16x1xf32>
    %3 = tpu.iota {dimensions = array<i32: 0>} : vector<16x256xi32>
    %c12_i32 = arith.constant 12 : i32
    %4 = vector.broadcast %c12_i32 : i32 to vector<16x256xi32>
    %5 = arith.cmpi sge, %3, %4 : vector<16x256xi32>
    %c0_5 = arith.constant 0 : index
    %c0_6 = arith.constant 0 : index
    %c0_7 = arith.constant 0 : index
    %6 = vector.load %arg1[%c0_5, %c0_6, %c0_7] : memref<1x16x256xf32, #tpu.memory_space<vmem>>, vector<1x16x256xf32>
    %7 = vector.shape_cast %6 : vector<1x16x256xf32> to vector<16x256xf32>
    %cst = arith.constant dense<0.000000e+00> : vector<24x256xf32>
    %8 = tpu.matmul %0, %7, %cst {dimension_numbers = #tpu.dot_dimension_numbers<[1], [0], [0], [1], [0, 0, 1, 1], [], []>} : vector<24x16xf32>, vector<16x256xf32>, vector<24x256xf32> -> vector<24x256xf32>
    %cst_8 = arith.constant dense<0.000000e+00> : vector<24xf32>
    %9 = vector.multi_reduction <add>, %8, %cst_8 [1] : vector<24x256xf32> to vector<24xf32>
    %10 = vector.shape_cast %9 : vector<24xf32> to vector<24x1xf32>
    %cst_9 = arith.constant 3.906250e-03 : f32
    %11 = vector.broadcast %cst_9 : f32 to vector<24x1xf32>
    %12 = arith.mulf %10, %11 : vector<24x1xf32>
    %13 = arith.mulf %8, %8 : vector<24x256xf32>
    %cst_10 = arith.constant dense<0.000000e+00> : vector<24xf32>
    %14 = vector.multi_reduction <add>, %13, %cst_10 [1] : vector<24x256xf32> to vector<24xf32>
    %15 = vector.shape_cast %14 : vector<24xf32> to vector<24x1xf32>
    %cst_11 = arith.constant 3.906250e-03 : f32
    %16 = vector.broadcast %cst_11 : f32 to vector<24x1xf32>
    %17 = arith.mulf %15, %16 : vector<24x1xf32>
    %18 = arith.mulf %12, %12 : vector<24x1xf32>
    %19 = arith.subf %17, %18 : vector<24x1xf32>
    %cst_12 = arith.constant 0.000000e+00 : f32
    %20 = vector.broadcast %cst_12 : f32 to vector<24x1xf32>
    %21 = arith.maximumf %19, %20 : vector<24x1xf32>
    %cst_13 = arith.constant 9.99999974E-6 : f32
    %22 = vector.broadcast %cst_13 : f32 to vector<24x1xf32>
    %23 = arith.addf %21, %22 : vector<24x1xf32>
    %24 = math.rsqrt %23 : vector<24x1xf32>
    %cst_14 = arith.constant 0.000000e+00 : f32
    %25 = vector.broadcast %cst_14 : f32 to vector<24x1xf32>
    %26 = arith.subf %25, %12 : vector<24x1xf32>
    %27 = arith.mulf %26, %24 : vector<24x1xf32>
    %28 = tpu.transpose %24, [1, 0] : vector<24x1xf32> -> vector<1x24xf32>
    %29 = tpu.transpose %27, [1, 0] : vector<24x1xf32> -> vector<1x24xf32>
    %30 = vector.broadcast %28 : vector<1x24xf32> to vector<16x24xf32>
    %31 = arith.mulf %1, %30 : vector<16x24xf32>
    %32 = vector.broadcast %29 : vector<1x24xf32> to vector<16x24xf32>
    %33 = arith.mulf %1, %32 : vector<16x24xf32>
    %cst_15 = arith.constant dense<0.000000e+00> : vector<16xf32>
    %34 = vector.multi_reduction <add>, %33, %cst_15 [1] : vector<16x24xf32> to vector<16xf32>
    %35 = vector.shape_cast %34 : vector<16xf32> to vector<16x1xf32>
    %36 = arith.addf %2, %35 : vector<16x1xf32>
    %cst_16 = arith.constant dense<0.000000e+00> : vector<16x256xf32>
    %37 = tpu.matmul %31, %8, %cst_16 {dimension_numbers = #tpu.dot_dimension_numbers<[1], [0], [0], [1], [0, 0, 1, 1], [], []>} : vector<16x24xf32>, vector<24x256xf32>, vector<16x256xf32> -> vector<16x256xf32>
    %38 = vector.broadcast %36 : vector<16x1xf32> to vector<16x256xf32>
    %39 = arith.addf %37, %38 : vector<16x256xf32>
    %cst_17 = arith.constant 0.000000e+00 : f32
    %40 = vector.broadcast %cst_17 : f32 to vector<16x256xf32>
    %41 = arith.select %5, %7, %40 : vector<16x256xi1>, vector<16x256xf32>
    %42 = arith.addf %39, %41 : vector<16x256xf32>
    %c0_18 = arith.constant 0 : index
    %c0_19 = arith.constant 0 : index
    %c0_20 = arith.constant 0 : index
    %43 = vector.load %arg5[%c0_18, %c0_19, %c0_20] : memref<1x16x256xf32, #tpu.memory_space<vmem>>, vector<1x16x256xf32>
    %44 = vector.shape_cast %43 : vector<1x16x256xf32> to vector<16x256xf32>
    %45 = vector.shape_cast %42 : vector<16x256xf32> to vector<1x16x256xf32>
    tpu.vector_store %arg5[%c0_18, %c0_19, %c0_20], %45 {strides = array<i32>} : memref<1x16x256xf32, #tpu.memory_space<vmem>>, vector<1x16x256xf32>,
    return
  }
  func.func @transform_0(%arg0: i32) -> (i32, i32, i32) {
    %c0_i32 = arith.constant 0 : i32
    %c0_i32_0 = arith.constant 0 : i32
    %c0_i32_1 = arith.constant 0 : i32
    return %arg0, %c0_i32, %c0_i32_0 : i32, i32, i32
  }
  func.func @transform_1(%arg0: i32) -> (i32, i32) {
    %c0_i32 = arith.constant 0 : i32
    %c0_i32_0 = arith.constant 0 : i32
    %c0_i32_1 = arith.constant 0 : i32
    return %c0_i32, %c0_i32_0 : i32, i32
  }
  func.func @transform_2(%arg0: i32) -> (i32, i32) {
    %c0_i32 = arith.constant 0 : i32
    %c0_i32_0 = arith.constant 0 : i32
    %c0_i32_1 = arith.constant 0 : i32
    return %c0_i32, %c0_i32_0 : i32, i32
  }
  func.func @transform_3(%arg0: i32) -> (i32, i32) {
    %c0_i32 = arith.constant 0 : i32
    %c0_i32_0 = arith.constant 0 : i32
    %c0_i32_1 = arith.constant 0 : i32
    return %c0_i32, %c0_i32_0 : i32, i32
  }
  func.func @transform_4(%arg0: i32) -> (i32, i32, i32) {
    %c0_i32 = arith.constant 0 : i32
    %c0_i32_0 = arith.constant 0 : i32
    %c0_i32_1 = arith.constant 0 : i32
    return %arg0, %c0_i32, %c0_i32_0 : i32, i32, i32
  }
}

</mosaic_0001>

<bundles_post_ra>
// kernel: cam_forward.1
= control target key start
LH: loop header
LB: loop body
LE: loop exit
PB: predicated region body
PF: predicated region fallthrough
CT: control target
= control target key end

     0   :  { %s682_s15 = smov 0   ;;  %s740_s0 = inlined_call_operand.vmem [shape: f32[2,16,256], index: 0, kind: input, shape index: {}]   ;;  %s741_s1 = inlined_call_operand.vmem [shape: f32[24,16], index: 1, kind: input, shape index: {}]   ;;  %s742_s2 = inlined_call_operand.vmem [shape: f32[16,24], index: 2, kind: input, shape index: {}]   ;;  %s743_s3 = inlined_call_operand.vmem [shape: f32[16,1], index: 3, kind: input, shape index: {}]   ;;  %s744_s4 = inlined_call_operand.vmem [shape: f32[2,16,256], index: 4, kind: output, shape index: {}]  }
   0x1 LB: > { %s603_s16 = sadd.s32 4294967295, %s653_s15   ;;  %p607_p0 = scmp.ge.s32.totalorder %s653_s15, 1  ;;  %s653_s15 = sphi %s682_s15, %s14_s15  }
   0x2   : > { %p162_p1 = scmp.lt.s32.totalorder %s653_s15, 3 }
   0x4   : > { %p163_p2 = pnand %p607_p0, %p162_p1 }
   0x5   : > { %p188_p3 = scmp.lt.s32.totalorder (!%p163_p2), %s603_s16, 1  ;;  %v655_v0 = vmov (!%p163_p2), 0.0   ;;  %v198_v7 = vld [vmem:[%s741_s1] sm:$0xff] (!%p163_p2)  ;;  %vm214_vm0 = vcmask (!%p163_p2), 130048   ;;  %v199_v8 = vld [vmem:[%s741_s1 + $0x8] sm:$0xff] (!%p163_p2)  ;;  %v200_v9 = vld [vmem:[%s741_s1 + $0x10] sm:$0xff] (!%p163_p2)  ;;  %v205_v63 = vlaneseq (!%p163_p2) }
   0x6   : > { %166 = sbr.rel (%p163_p2) target bundleno = 816 (0x330), region = 36  ;;  %288 = vmatprep.mubr.f32.mxu0 (!%p163_p2), %v655_v0  ;;  %523 = vmatprep.mubr.f32.mxu1 (!%p163_p2), %v655_v0  ;;  %vm434_vm1 = vcmask (!%p163_p2), 195584  }
   0xd   : > { %s746_s16 = smov (!%p188_p3, %s603_s16), 1 }
   0xe   : > { %s619_s17 = sshll.u32 %s746_s16, 5 }
   0xf   : > { %s192_s20 = scalar_lea.vmem %s740_s0, %s619_s17  ;;  %s197_s11 = scalar_lea.vmem %s744_s4, %s619_s17 }
  0x10   : > { %v211_v1 = vld [vmem:[%s192_s20 + $0x8] sm:$0xff]  ;;  %v700_v2 = vld [vmem:[%s192_s20 + $0x18] sm:$0xff]  ;;  %v210_v3 = vld [vmem:[%s192_s20] sm:$0xff] }
  0x11   : > { %v621_v4 = vpack.c.bf16 %v700_v2, %v211_v1  ;;  %v703_v5 = vld [vmem:[%s192_s20 + $0x10] sm:$0xff]  ;;  %v206_v1 = vshrl.u32 %v205_v63, 7 }
  0x12   : > { %v623_v6 = vpack.c.bf16 %v703_v5, %v210_v3 }
  0x13   : > { %622 = vmatprep.subr.bf16.mxu0 %v621_v4  ;;  %v424_v3 = vsub.s32 0, %v206_v1 }
  0x14   : > { %624 = vmatpush1.bf16.msra.mxu0 %v623_v6 }
  0x17   : > { %612 = vmatmul.mubr.msk.f32.vlgmr.msra.gmra.mrb[0].mxu0 %vm214_vm0, %v198_v7 }
  0x18   : > { %294 = vmatprep.mubr.f32.mxu0 %v655_v0 }
  0x1b   : > { %613 = vmatmul.mubr.msk.f32.gmra.mrb[2].mxu0 %vm214_vm0, %v199_v8  ;;  %v202_v8 = vld [vmem:[%s742_s2 + $0x8] sm:$0xff] }
  0x1c   : > { %300 = vmatprep.mubr.f32.mxu0 %v655_v0 }
  0x1f   : > { %614 = vmatmul.mubr.msk.f32.gmra.mrb[4].mxu0 %vm214_vm0, %v200_v9  ;;  %v201_v9 = vld [vmem:[%s742_s2] sm:$0xff] }
  0xea   : > { %v290_v10 = vpop.f32.mrb[0].mxu0 }
  0xeb   : > { %v292_v11 = vpop.f32.mrb[1].mxu0  ;;  %v319_v12 = vmul.f32 %v290_v10, %v290_v10 }
  0xec   : > { %v307_v13 = vadd.f32 %v292_v11, %v290_v10  ;;  %v320_v14 = vmul.f32 %v292_v11, %v292_v11 }
  0xee   : > { %308 = vadd.xlane.f32.xlu0 %v307_v13  ;;  %v296_v15 = vpop.f32.mrb[2].mxu0  ;;  %v325_v16 = vadd.f32 %v320_v14, %v319_v12 }
  0xef   : > { %v298_v17 = vpop.f32.mrb[3].mxu0  ;;  %v627_v18 = vpack.c.bf16 %v296_v15, %v290_v10  ;;  %v321_v19 = vmul.f32 %v296_v15, %v296_v15 }
  0xf0   : > { %326 = vadd.xlane.f32.xlu1 %v325_v16  ;;  %v625_v20 = vpack.c.bf16 %v298_v17, %v292_v11  ;;  %v310_v21 = vadd.f32 %v298_v17, %v296_v15  ;;  %v322_v22 = vmul.f32 %v298_v17, %v298_v17  ;;  %v656_v17 = vmov 0  }
  0xf2   : > { %626 = vmatprep.subr.bf16.mxu1 %v625_v20  ;;  %311 = vadd.xlane.f32.xlu0 %v310_v21  ;;  %v302_v23 = vpop.f32.mrb[4].mxu0  ;;  %v328_v24 = vadd.f32 %v322_v22, %v321_v19  ;;  %v203_v19 = vld [vmem:[%s743_s3] sm:$0xff] }
  0xf3   : > { %v304_v25 = vpop.f32.mrb[5].mxu0  ;;  %628 = vmatpush1.bf16.msra.mxu1 %v627_v18  ;;  %v323_v26 = vmul.f32 %v302_v23, %v302_v23  ;;  %v204_v18 = vld [vmem:[%s743_s3 + $0x8] sm:$0xff] }
  0xf4   : > { %v324_v27 = vmul.f32 %v304_v25, %v304_v25  ;;  %463 = vmatprep.subr.mxu1 %v304_v25  ;;  %v313_v28 = vadd.f32 %v304_v25, %v302_v23 }
  0xf6   : > { %329 = vadd.xlane.f32.xlu0 %v328_v24  ;;  %314 = vadd.xlane.f32.xlu1 %v313_v28  ;;  %v331_v29 = vadd.f32 %v324_v27, %v323_v26  ;;  %v207_v27 = vadd.s32 8, %v206_v1 }
  0xf7   : > { %464 = vmatpush1.msra.mxu1 %v302_v23 }
  0xf8   : > { %vm209_vm2 = vcmp.ge.s32.totalorder %v207_v27, 12 }
  0xf9   : > { %v539_v28 = vsel %vm209_vm2, %v700_v2, 0.0 }
  0xfa   : > { %332 = vadd.xlane.f32.xlu1 %v331_v29  ;;  %v538_v29 = vsel %vm209_vm2, %v703_v5, 0.0 }
 0x17b   : > { %v309_v30 = vpop.xlane.xlu0 %308 }
 0x17c   : > { %v316_v31 = vmul.f32 0.00390625, %v309_v30 }
 0x17d   : > { %v327_v32 = vpop.xlane.xlu1 %326 }
 0x17e   : > { %v337_v33 = vmul.f32 %v316_v31, %v316_v31  ;;  %v334_v34 = vmul.f32 0.00390625, %v327_v32  ;;  %v352_v54 = vsub.f32 0.0, %v316_v31 }
 0x17f   : > { %v312_v35 = vpop.xlane.xlu0 %311 }
 0x180   : > { %v340_v36 = vsub.f32 %v334_v34, %v337_v33  ;;  %v317_v37 = vmul.f32 0.00390625, %v312_v35 }
 0x182   : > { %v343_v38 = vmax.f32 %v340_v36, 0.0  ;;  %v338_v42 = vmul.f32 %v317_v37, %v317_v37  ;;  %v353_v57 = vsub.f32 0.0, %v317_v37 }
 0x183   : > { %v330_v39 = vpop.xlane.xlu0 %329  ;;  %v315_v40 = vpop.xlane.xlu1 %314 }
 0x184   : > { %v346_v41 = vadd.f32 1e-05, %v343_v38  ;;  %v335_v43 = vmul.f32 0.00390625, %v330_v39  ;;  %v318_v44 = vmul.f32 0.00390625, %v315_v40 }
 0x186   : > { %641 = vrsqrt.f32 %v346_v41  ;;  %v341_v45 = vsub.f32 %v335_v43, %v338_v42  ;;  %v339_v48 = vmul.f32 %v318_v44, %v318_v44  ;;  %v354_v60 = vsub.f32 0.0, %v318_v44 }
 0x187   : > { %v333_v46 = vpop.xlane.xlu1 %332 }
 0x188   : > { %v344_v47 = vmax.f32 %v341_v45, 0.0  ;;  %v336_v49 = vmul.f32 0.00390625, %v333_v46 }
 0x18a   : > { %v347_v50 = vadd.f32 1e-05, %v344_v47  ;;  %v342_v51 = vsub.f32 %v336_v49, %v339_v48 }
 0x18c   : > { %643 = vrsqrt.f32 %v347_v50  ;;  %v345_v52 = vmax.f32 %v342_v51, 0.0 }
 0x18e   : > { %v348_v53 = vadd.f32 1e-05, %v345_v52 }
 0x190   : > { %v642_v55 = vpop.eup %641  ;;  %645 = vrsqrt.f32 %v348_v53 }
 0x191   : > { %358 = vxpose.xlu0.b32.start [1/3] (short) (narrow) %v642_v55, 8  ;;  %v355_v56 = vmul.f32 %v642_v55, %v352_v54 }
 0x193   : > { %390 = vxpose.xlu1.b32.start [1/3] (short) (narrow) %v355_v56, 8 }
 0x196   : > { %v644_v58 = vpop.eup %643 }
 0x197   : > { %359 = vxpose.xlu0.b32.cont [2/3] (short) (narrow) %v644_v58, 8  ;;  %v356_v59 = vmul.f32 %v644_v58, %v353_v57 }
 0x199   : > { %391 = vxpose.xlu1.b32.cont [2/3] (short) (narrow) %v356_v59, 8 }
 0x19a   : > { %v646_v61 = vpop.eup %645 }
 0x19b   : > { %360 = vxpose.xlu0.b32.end [3/3] (short) (narrow) %v646_v61, 8  ;;  %v357_v62 = vmul.f32 %v646_v61, %v354_v60 }
 0x19d   : > { %392 = vxpose.xlu1.b32.end [3/3] (short) (narrow) %v357_v62, 8 }
 0x1bb   : > { %640 = vset.pattern.permute.xlu1 %v656_v17 }
 0x1c4   : > { %639 = vset.pattern.permute.xlu0 %v656_v17 }
 0x213   : > { %v374_v4 = vpop.trf.xlu0 }
 0x214   : > { %v425_v6 = vrot.slane %v374_v4, %v424_v3 }
 0x215   : > { %v406_v7 = vpop.trf.xlu1 }
 0x216   : > { %v431_v10 = vrot.slane %v406_v7, %v424_v3  ;;  %v426_v11 = vmul.f32 %v425_v6, %v201_v9  ;;  %v427_v14 = vmul.f32 %v425_v6, %v202_v8 }
 0x218   : > { %v433_v12 = vmul.f32 %v431_v10, %v202_v8  ;;  %v432_v13 = vmul.f32 %v431_v10, %v201_v9  ;;  %615 = vmatmul.mubr.msk.f32.vlgmr.msra.gmra.mrb[0].mxu1 %vm434_vm1, %v426_v11 }
 0x219   : > { %529 = vmatprep.mubr.f32.mxu1 %v655_v0 }
 0x21a   : > { %v438_v15 = vsel %vm434_vm1, %v433_v12, 0.0  ;;  %v435_v16 = vsel %vm434_vm1, %v432_v13, 0.0 }
 0x21b   : > { %439 = vadd.xlane.f32.xlu0 %v438_v15  ;;  %436 = vadd.xlane.f32.xlu1 %v435_v16 }
 0x21c   : > { %616 = vmatmul.mubr.msk.f32.gmra.mrb[2].mxu1 %vm434_vm1, %v427_v14 }
 0x2a8   : > { %v440_v20 = vpop.xlane.xlu0 %439  ;;  %v437_v21 = vpop.xlane.xlu1 %436 }
 0x2a9   : > { %v442_v0 = vadd.f32 %v440_v20, %v204_v18  ;;  %v441_v22 = vadd.f32 %v437_v21, %v203_v19 }
 0x2ab   : > { %450 = vperm.xlu0 %639, %v442_v0   ;;  %445 = vperm.xlu1 %640, %v441_v22  }
 0x2eb   : > { %v525_v23 = vpop.f32.mrb[0].mxu1 }
 0x2ec   : > { %v527_v24 = vpop.f32.mrb[1].mxu1 }
 0x2ef   : > { %v531_v25 = vpop.f32.mrb[2].mxu1 }
 0x2f0   : > { %v533_v26 = vpop.f32.mrb[3].mxu1 }
 0x32a   : > { %v451_v30 = vpop.permute.xlu0 %450  ;;  %v446_v31 = vpop.permute.xlu1 %445 }
 0x32b   : > { %v532_v32 = vadd.f32 %v531_v25, %v451_v30  ;;  %v534_v33 = vadd.f32 %v533_v26, %v451_v30  ;;  %v526_v34 = vadd.f32 %v525_v23, %v446_v31  ;;  %v528_v35 = vadd.f32 %v527_v24, %v446_v31 }
 0x32d   : > { %v542_v36 = vadd.f32 %v538_v29, %v532_v32  ;;  %v543_v37 = vadd.f32 %v539_v28, %v534_v33  ;;  %544 = vst [vmem:[%s197_s11] sm:$0xff] %v526_v34  ;;  %545 = vst [vmem:[%s197_s11 + $0x8] sm:$0xff] %v528_v35 }
 0x32f   : > { %546 = vst [vmem:[%s197_s11 + $0x10] sm:$0xff] %v542_v36  ;;  %547 = vst [vmem:[%s197_s11 + $0x18] sm:$0xff] %v543_v37 }
 0x330 PF: > { %s14_s15 = sadd.s32 1, %s653_s15  }
 0x331   : > { %p11_p4 = scmp.ge.s32.totalorder %s14_s15, 4  }
 0x333   :  { %13 = sbr.rel (!%p11_p4) target bundleno = 1 (0x1), region = 66 }

</bundles_post_ra>
